<compile_context>
chip_gen: v7x
topology: tpu7x:2x2x1
jax: 0.10.0
libtpu: 0.0.40
codegen_flags: <defaults>
</compile_context>

<pallas_src>
import functools

import jax
import jax.numpy as jnp
from jax import lax
from jax.experimental import pallas as pl
from jax.experimental.pallas import tpu as pltpu


_MAX_TILE_B = 16384              # lane-tile cap: double-buffered x + f32 temps stay
                                 # comfortably inside v7x's 64 MiB VMEM
_VMEM_LIMIT_BYTES = 48 * 1024 * 1024   # > v5e's 16 MiB default scoped limit,
                                       # < v7x's 64 MiB physical VMEM


def _leaky_relu(x, negative_slope=0.01):
    # max(x, a*x) == LeakyReLU for 0 < a < 1; one VPU op cheaper than cmp+select.
    return jnp.maximum(x, negative_slope * x)


def _net_kernel(x_ref, w1T_ref, b1T_ref, wT_ref, bT_ref, woutT_ref, boutT_ref,
                oT_ref, *, layers):
    f32 = jnp.float32
    x_blk = x_ref[...]                       # (tile_b, d_in), as stored -- no HBM transpose
    w1 = w1T_ref[...].astype(x_blk.dtype)    # (nodes, d_in); tiny, VMEM-resident

    # fc1 as a trans-contraction: contract d_in of BOTH operands so the result
    # comes out already transposed as (nodes, tile_b) (batch on the lane axis).
    z = lax.dot_general(w1, x_blk,
                        dimension_numbers=(((1,), (1,)), ((), ())),
                        preferred_element_type=f32)
    h = _leaky_relu(z + b1T_ref[...].astype(f32))      # (nodes, 1) implicit lane bcast

    # Hoist loop-invariant (tiny) weight/bias loads out of the unrolled loop;
    # keep intermediates in f32 (no per-layer bf16 pack/unpack).
    w = wT_ref[...].astype(f32)              # (nodes, nodes)
    b = bT_ref[...].astype(f32)              # (nodes, 1) -> implicit broadcast per add
    for _ in range(layers):
        # NOTE: for large `layers` (>~8) switch to lax.fori_loop(..., unroll=True)
        # to bound vreg live ranges; at layers=3 full unroll is fine.
        z = jnp.dot(w, h, preferred_element_type=f32)
        h = _leaky_relu(z + b)

    # Out-projection hoisted out of the loop: only the last a1 survives.
    a1 = jnp.dot(woutT_ref[...].astype(f32), h, preferred_element_type=f32)
    a1 = a1 + boutT_ref[...].astype(f32)
    oT_ref[...] = jax.nn.sigmoid(a1).astype(oT_ref.dtype)   # lane-dense (1, tile_b)


def prepare_params(params, compute_dtype=jnp.float32):
    """One-time conversion of the (tiny) weights into the kernel layout.

    Hoisted out of the per-call hot path. Only w1 is kept in `compute_dtype`
    (it pairs with x for the single large matmul); everything downstream stays
    f32 since in-kernel intermediates are f32 anyway.
    """
    return {
        "w1T": params["w1"].T.astype(compute_dtype),     # (nodes, d_in)
        "b1T": params["b1"].T.astype(jnp.float32),       # (nodes, 1)
        "wT": params["w"].T.astype(jnp.float32),         # (nodes, nodes)
        "bT": params["b"].T.astype(jnp.float32),         # (nodes, 1)
        "woutT": params["wout"].T.astype(jnp.float32),   # (1, nodes)
        "boutT": params["bout"].T.astype(jnp.float32),   # (1, 1)
    }


def _pick_tile_b(B):
    if B <= 1024:
        return B                   # single full block (block == full array dims)
    # Big lane tiles amortize the ~0.35 us per-grid-step overhead. Size so the
    # grid has at least 2 steps (both v7x TensorCores get work), keep tile_b a
    # multiple of 128 (lane-dense unmasked stores), cap for VMEM headroom.
    half = -(-B // 2)
    tile = ((half + 127) // 128) * 128
    return min(tile, _MAX_TILE_B)


def net_forward(x, prepared, *, layers, tile_b=None):
    """x: (B, d_in), any float dtype (store x in bf16 upstream for the DMA win).
    prepared: output of prepare_params. Returns (B, 1) float32."""
    if layers < 1:
        raise ValueError("layers must be >= 1 (matches the PyTorch forward).")
    B, d_in = x.shape
    nodes, d_in_w = prepared["w1T"].shape
    assert d_in == d_in_w, (d_in, d_in_w)

    if tile_b is None:
        tile_b = _pick_tile_b(B)
    if tile_b < B and tile_b % 128 != 0:
        raise ValueError("tile_b must be a multiple of 128 when tiling the batch.")
    grid = (pl.cdiv(B, tile_b),)

    def const_spec(shape):          # VMEM-resident across the whole grid
        return pl.BlockSpec(shape, lambda i: (0, 0))

    weight_bytes = sum(int(a.size) * a.dtype.itemsize for a in prepared.values())
    cost = pl.CostEstimate(
        flops=2 * B * (d_in * nodes + layers * nodes * nodes + nodes),
        transcendentals=B,                                        # sigmoid
        bytes_accessed=B * d_in * x.dtype.itemsize + B * 4 + weight_bytes,
    )

    kernel = functools.partial(_net_kernel, layers=layers)
    yT = pl.pallas_call(
        kernel,
        out_shape=jax.ShapeDtypeStruct((1, B), jnp.float32),
        grid=grid,
        in_specs=[
            pl.BlockSpec((tile_b, d_in), lambda i: (i, 0)),   # x, tiled on batch
            const_spec((nodes, d_in)),                        # w1T
            const_spec((nodes, 1)),                           # b1T
            const_spec((nodes, nodes)),                       # wT
            const_spec((nodes, 1)),                           # bT
            const_spec((1, nodes)),                           # woutT
            const_spec((1, 1)),                               # boutT
        ],
        out_specs=pl.BlockSpec((1, tile_b), lambda i: (0, i)),   # lane-dense out
        compiler_params=pltpu.CompilerParams(
            dimension_semantics=("parallel",),        # shard batch over v7x cores
            vmem_limit_bytes=_VMEM_LIMIT_BYTES,
        ),
        cost_estimate=cost,
    )(x, prepared["w1T"], prepared["b1T"], prepared["wT"], prepared["bT"],
      prepared["woutT"], prepared["boutT"])
    return yT.reshape(B, 1)        # (1, B) -> (B, 1); pure reshape, no transpose


def init_params(key, d_in, nodes):
    """Deterministic init mimicking nn.Linear default (uniform +-1/sqrt(fan_in))."""
    ks = jax.random.split(key, 6)

    def lin(kw, kb, fan_in, fan_out):
        bound = 1.0 / (fan_in ** 0.5)
        w = jax.random.uniform(kw, (fan_in, fan_out), jnp.float32, -bound, bound)
        b = jax.random.uniform(kb, (1, fan_out), jnp.float32, -bound, bound)
        return w, b

    w1, b1 = lin(ks[0], ks[1], d_in, nodes)
    w, b = lin(ks[2], ks[3], nodes, nodes)
    wout, bout = lin(ks[4], ks[5], nodes, 1)
    return {"w1": w1, "b1": b1, "w": w, "b": b, "wout": wout, "bout": bout}


def _ref_forward(x, p, layers):
    # Pure-JAX mirror of the PyTorch forward (out-projection inside the loop;
    # only the last a1 survives -> identical to hoisting it after the loop).
    z = x @ p["w1"] + p["b1"]
    h = jnp.where(z >= 0, z, 0.01 * z)
    a1 = None
    for _ in range(layers):
        z = h @ p["w"] + p["b"]
        h = jnp.where(z >= 0, z, 0.01 * z)
        a1 = h @ p["wout"] + p["bout"]
    return jax.nn.sigmoid(a1)


if __name__ == "__main__":
    D_IN, NODES, LAYERS = 16, 32, 3

    key = jax.random.PRNGKey(0)
    k_x, k_xb, k_p = jax.random.split(key, 3)
    params = init_params(k_p, D_IN, NODES)
    prepared_f32 = prepare_params(params, jnp.float32)   # weights converted once

    # --- small batch: single full block ---
    x = jax.random.normal(k_x, (8, D_IN), jnp.float32)
    y = net_forward(x, prepared_f32, layers=LAYERS)
    jax.block_until_ready(y)
    y_ref = _ref_forward(x, params, LAYERS)
    assert y.shape == (8, 1)
    assert jnp.allclose(y, y_ref, atol=1e-5, rtol=1e-5)

    # --- larger batch (not a tile multiple): exercises the tiled path, the
    #     masked tail block, and the >=2-grid-step rule for v7x megacore ---
    x_big = jax.random.normal(k_xb, (4100, D_IN), jnp.float32)
    y_big = net_forward(x_big, prepared_f32, layers=LAYERS)
    jax.block_until_ready(y_big)
    y_big_ref = _ref_forward(x_big, params, LAYERS)
    assert y_big.shape == (4100, 1)
    assert jnp.allclose(y_big, y_big_ref, atol=1e-5, rtol=1e-5)

    # --- bf16 x path (cast ONCE at the source, not per call): halves x's HBM
    #     bytes; intermediates stay f32 in-kernel, so tolerance is modest ---
    prepared_bf16 = prepare_params(params, jnp.bfloat16)
    x_bf16 = x_big.astype(jnp.bfloat16)                   # "source" storage dtype
    y_bf16 = net_forward(x_bf16, prepared_bf16, layers=LAYERS)
    jax.block_until_ready(y_bf16)
    assert y_bf16.shape == (4100, 1)
    assert jnp.allclose(y_bf16, y_big_ref, atol=3e-2, rtol=0)

    print("KERNEL_OK")
</pallas_src>

<mosaic_0001>
module attributes {stable_mosaic.version = 11 : i64} {
  func.func @_net_kernel(%arg0: i32, %arg1: memref<8x16xf32, #tpu.memory_space<vmem>>, %arg2: memref<32x16xf32, #tpu.memory_space<vmem>>, %arg3: memref<32x1xf32, #tpu.memory_space<vmem>>, %arg4: memref<32x32xf32, #tpu.memory_space<vmem>>, %arg5: memref<32x1xf32, #tpu.memory_space<vmem>>, %arg6: memref<1x32xf32, #tpu.memory_space<vmem>>, %arg7: memref<1x1xf32, #tpu.memory_space<vmem>>, %arg8: memref<1x8xf32, #tpu.memory_space<vmem>>) attributes {dimension_semantics = [#tpu.dimension_semantics<parallel>], iteration_bounds = array<i64: 1>, scalar_prefetch = 0 : i64, scratch_operands = 0 : i64, tpu.core_type = #tpu.core_type<tc>, window_params = [{transform_indices = @transform_0, window_bounds = array<i64: 8, 16>}, {pipeline_mode = #tpu.pipeline_mode<synchronous>, transform_indices = @transform_1, window_bounds = array<i64: 32, 16>}, {pipeline_mode = #tpu.pipeline_mode<synchronous>, transform_indices = @transform_2, window_bounds = array<i64: 32, 1>}, {pipeline_mode = #tpu.pipeline_mode<synchronous>, transform_indices = @transform_3, window_bounds = array<i64: 32, 32>}, {pipeline_mode = #tpu.pipeline_mode<synchronous>, transform_indices = @transform_4, window_bounds = array<i64: 32, 1>}, {pipeline_mode = #tpu.pipeline_mode<synchronous>, transform_indices = @transform_5, window_bounds = array<i64: 1, 32>}, {pipeline_mode = #tpu.pipeline_mode<synchronous>, transform_indices = @transform_6, window_bounds = array<i64: 1, 1>}, {transform_indices = @transform_7, window_bounds = array<i64: 1, 8>}]} {
    %c0 = arith.constant 0 : index
    %c0_0 = arith.constant 0 : index
    %0 = vector.load %arg1[%c0, %c0_0] : memref<8x16xf32, #tpu.memory_space<vmem>>, vector<8x16xf32>
    %c0_1 = arith.constant 0 : index
    %c0_2 = arith.constant 0 : index
    %1 = vector.load %arg2[%c0_1, %c0_2] : memref<32x16xf32, #tpu.memory_space<vmem>>, vector<32x16xf32>
    %cst = arith.constant dense<0.000000e+00> : vector<32x8xf32>
    %2 = tpu.matmul %1, %0, %cst {dimension_numbers = #tpu.dot_dimension_numbers<[1], [1], [0], [0], [0, 0, 1, 0], [], []>} : vector<32x16xf32>, vector<8x16xf32>, vector<32x8xf32> -> vector<32x8xf32>
    %c0_3 = arith.constant 0 : index
    %c0_4 = arith.constant 0 : index
    %3 = vector.load %arg3[%c0_3, %c0_4] : memref<32x1xf32, #tpu.memory_space<vmem>>, vector<32x1xf32>
    %4 = vector.broadcast %3 : vector<32x1xf32> to vector<32x8xf32>
    %5 = arith.addf %2, %4 : vector<32x8xf32>
    %cst_5 = arith.constant 0.00999999977 : f32
    %6 = vector.broadcast %cst_5 : f32 to vector<32x8xf32>
    %7 = arith.mulf %6, %5 : vector<32x8xf32>
    %8 = arith.maximumf %5, %7 : vector<32x8xf32>
    %c0_6 = arith.constant 0 : index
    %c0_7 = arith.constant 0 : index
    %9 = vector.load %arg4[%c0_6, %c0_7] : memref<32x32xf32, #tpu.memory_space<vmem>>, vector<32x32xf32>
    %c0_8 = arith.constant 0 : index
    %c0_9 = arith.constant 0 : index
    %10 = vector.load %arg5[%c0_8, %c0_9] : memref<32x1xf32, #tpu.memory_space<vmem>>, vector<32x1xf32>
    %cst_10 = arith.constant dense<0.000000e+00> : vector<32x8xf32>
    %11 = tpu.matmul %9, %8, %cst_10 {dimension_numbers = #tpu.dot_dimension_numbers<[1], [0], [0], [1], [0, 0, 1, 1], [], []>} : vector<32x32xf32>, vector<32x8xf32>, vector<32x8xf32> -> vector<32x8xf32>
    %12 = vector.broadcast %10 : vector<32x1xf32> to vector<32x8xf32>
    %13 = arith.addf %11, %12 : vector<32x8xf32>
    %cst_11 = arith.constant 0.00999999977 : f32
    %14 = vector.broadcast %cst_11 : f32 to vector<32x8xf32>
    %15 = arith.mulf %14, %13 : vector<32x8xf32>
    %16 = arith.maximumf %13, %15 : vector<32x8xf32>
    %cst_12 = arith.constant dense<0.000000e+00> : vector<32x8xf32>
    %17 = tpu.matmul %9, %16, %cst_12 {dimension_numbers = #tpu.dot_dimension_numbers<[1], [0], [0], [1], [0, 0, 1, 1], [], []>} : vector<32x32xf32>, vector<32x8xf32>, vector<32x8xf32> -> vector<32x8xf32>
    %18 = vector.broadcast %10 : vector<32x1xf32> to vector<32x8xf32>
    %19 = arith.addf %17, %18 : vector<32x8xf32>
    %cst_13 = arith.constant 0.00999999977 : f32
    %20 = vector.broadcast %cst_13 : f32 to vector<32x8xf32>
    %21 = arith.mulf %20, %19 : vector<32x8xf32>
    %22 = arith.maximumf %19, %21 : vector<32x8xf32>
    %cst_14 = arith.constant dense<0.000000e+00> : vector<32x8xf32>
    %23 = tpu.matmul %9, %22, %cst_14 {dimension_numbers = #tpu.dot_dimension_numbers<[1], [0], [0], [1], [0, 0, 1, 1], [], []>} : vector<32x32xf32>, vector<32x8xf32>, vector<32x8xf32> -> vector<32x8xf32>
    %24 = vector.broadcast %10 : vector<32x1xf32> to vector<32x8xf32>
    %25 = arith.addf %23, %24 : vector<32x8xf32>
    %cst_15 = arith.constant 0.00999999977 : f32
    %26 = vector.broadcast %cst_15 : f32 to vector<32x8xf32>
    %27 = arith.mulf %26, %25 : vector<32x8xf32>
    %28 = arith.maximumf %25, %27 : vector<32x8xf32>
    %c0_16 = arith.constant 0 : index
    %c0_17 = arith.constant 0 : index
    %29 = vector.load %arg6[%c0_16, %c0_17] : memref<1x32xf32, #tpu.memory_space<vmem>>, vector<1x32xf32>
    %cst_18 = arith.constant dense<0.000000e+00> : vector<1x8xf32>
    %30 = tpu.matmul %29, %28, %cst_18 {dimension_numbers = #tpu.dot_dimension_numbers<[1], [0], [0], [1], [0, 0, 1, 1], [], []>} : vector<1x32xf32>, vector<32x8xf32>, vector<1x8xf32> -> vector<1x8xf32>
    %c0_19 = arith.constant 0 : index
    %c0_20 = arith.constant 0 : index
    %31 = vector.load %arg7[%c0_19, %c0_20] : memref<1x1xf32, #tpu.memory_space<vmem>>, vector<1x1xf32>
    %32 = vector.broadcast %31 : vector<1x1xf32> to vector<1x8xf32>
    %33 = arith.addf %30, %32 : vector<1x8xf32>
    %34 = arith.negf %33 : vector<1x8xf32>
    %35 = math.exp %34 : vector<1x8xf32>
    %cst_21 = arith.constant 1.000000e+00 : f32
    %36 = vector.broadcast %cst_21 : f32 to vector<1x8xf32>
    %37 = arith.addf %36, %35 : vector<1x8xf32>
    %38 = arith.divf %36, %37 : vector<1x8xf32>
    %c0_22 = arith.constant 0 : index
    %c0_23 = arith.constant 0 : index
    %39 = vector.load %arg8[%c0_22, %c0_23] : memref<1x8xf32, #tpu.memory_space<vmem>>, vector<1x8xf32>
    tpu.vector_store %arg8[%c0_22, %c0_23], %38 {strides = array<i32>} : memref<1x8xf32, #tpu.memory_space<vmem>>, vector<1x8xf32>,
    return
  }
  func.func @transform_0(%arg0: i32) -> (i32, i32) {
    %c0_i32 = arith.constant 0 : i32
    %c0_i32_0 = arith.constant 0 : i32
    return %arg0, %c0_i32 : i32, i32
  }
  func.func @transform_1(%arg0: i32) -> (i32, i32) {
    %c0_i32 = arith.constant 0 : i32
    %c0_i32_0 = arith.constant 0 : i32
    %c0_i32_1 = arith.constant 0 : i32
    return %c0_i32, %c0_i32_0 : i32, i32
  }
  func.func @transform_2(%arg0: i32) -> (i32, i32) {
    %c0_i32 = arith.constant 0 : i32
    %c0_i32_0 = arith.constant 0 : i32
    %c0_i32_1 = arith.constant 0 : i32
    return %c0_i32, %c0_i32_0 : i32, i32
  }
  func.func @transform_3(%arg0: i32) -> (i32, i32) {
    %c0_i32 = arith.constant 0 : i32
    %c0_i32_0 = arith.constant 0 : i32
    %c0_i32_1 = arith.constant 0 : i32
    return %c0_i32, %c0_i32_0 : i32, i32
  }
  func.func @transform_4(%arg0: i32) -> (i32, i32) {
    %c0_i32 = arith.constant 0 : i32
    %c0_i32_0 = arith.constant 0 : i32
    %c0_i32_1 = arith.constant 0 : i32
    return %c0_i32, %c0_i32_0 : i32, i32
  }
  func.func @transform_5(%arg0: i32) -> (i32, i32) {
    %c0_i32 = arith.constant 0 : i32
    %c0_i32_0 = arith.constant 0 : i32
    %c0_i32_1 = arith.constant 0 : i32
    return %c0_i32, %c0_i32_0 : i32, i32
  }
  func.func @transform_6(%arg0: i32) -> (i32, i32) {
    %c0_i32 = arith.constant 0 : i32
    %c0_i32_0 = arith.constant 0 : i32
    %c0_i32_1 = arith.constant 0 : i32
    return %c0_i32, %c0_i32_0 : i32, i32
  }
  func.func @transform_7(%arg0: i32) -> (i32, i32) {
    %c0_i32 = arith.constant 0 : i32
    %c0_i32_0 = arith.constant 0 : i32
    return %c0_i32, %arg0 : i32, i32
  }
}

</mosaic_0001>

<bundles_post_ra>
// kernel: tpu_custom_call.1
= control target key start
LH: loop header
LB: loop body
LE: loop exit
PB: predicated region body
PF: predicated region fallthrough
CT: control target
= control target key end

     0   :  { %s905_s0 = inlined_call_operand.vmem [shape: f32[8,16], index: 0, kind: input, shape index: {}]   ;;  %s906_s1 = inlined_call_operand.vmem [shape: f32[32,16], index: 1, kind: input, shape index: {}]   ;;  %s907_s2 = inlined_call_operand.vmem [shape: f32[32,1], index: 2, kind: input, shape index: {}]   ;;  %s908_s3 = inlined_call_operand.vmem [shape: f32[32,32], index: 3, kind: input, shape index: {}]   ;;  %s909_s4 = inlined_call_operand.vmem [shape: f32[32,1], index: 4, kind: input, shape index: {}]   ;;  %s910_s5 = inlined_call_operand.vmem [shape: f32[1,32], index: 5, kind: input, shape index: {}]   ;;  %s911_s6 = inlined_call_operand.<no memory space> [shape: f32[1,1], index: 6, kind: input, shape index: {}]   ;;  %s912_s7 = inlined_call_operand.hbm [shape: f32[1,8], index: 7, kind: output, shape index: {}]  }
   0x1   :  { %v12_v0 = vstv %s911_s6 }
   0x2   :  { %13 = vst [vmem:[#allocation2] sm:$0x1] %v12_v0 }
   0x3   :  { %v29_v1 = vld [vmem:[%s905_s0] sm:$0xff]  ;;  %vm58_vm0 = vcmask 130048   ;;  %v31_v4 = vld [vmem:[%s906_s1 + $0x8] sm:$0xff]  ;;  %v772_v5 = vmov 0   ;;  %v36_v6 = vld [vmem:[%s907_s2 + $0x10] sm:$0xff] }
   0x4   :  { %v30_v2 = vld [vmem:[%s906_s1] sm:$0xff]  ;;  %646 = vmatprep.subr.msk.mxu0 %vm58_vm0, %v29_v1  ;;  %742 = vset.pattern.permute.xlu0 %v772_v5  ;;  %v32_v7 = vld [vmem:[%s906_s1 + $0x10] sm:$0xff]  ;;  %v35_v8 = vld [vmem:[%s907_s2 + $0x8] sm:$0xff] }
   0x5   :  { %648 = vmatprep.mubr.msk.f32.mxu0 %vm58_vm0, %v30_v2  ;;  %v34_v3 = vld [vmem:[%s907_s2] sm:$0xff]  ;;  %647 = vmatpush3.xpose.msk.msra.mxu0 %vm58_vm0, %v29_v1 }
   0x6   :  { %40 = vperm.xlu0 %742, %v34_v3   ;;  %743 = vset.pattern.permute.xlu1 %v772_v5 }
   0x7   :  { %50 = vperm.xlu1 %743, %v36_v6  }
   0x8   :  { %14 = vsyncpa [#allocation4], 0  ;;  %649 = vmatmul.mubr.msk.f32.vlgmr.msra.gmra.mrb[0].mxu0 %vm58_vm0, %v31_v4  ;;  %v37_v9 = vld [vmem:[%s907_s2 + $0x18] sm:$0xff]  ;;  %v171_v11 = vld [vmem:[%s909_s4] sm:$0xff]  ;;  %vm195_vm1 = vcmask 261120   ;;  %vm774_vm2 = vmmov 0  }
   0x9   :  { %651 = vmatprep.mubr.msk.f32.mxu0 %vm58_vm0, %v32_v7  ;;  %v33_v10 = vld [vmem:[%s906_s1 + $0x18] sm:$0xff]  ;;  %v172_v12 = vld [vmem:[%s909_s4 + $0x8] sm:$0xff]  ;;  %v173_v13 = vld [vmem:[%s909_s4 + $0x10] sm:$0xff]  ;;  %s776_s9 = smov [#allocation3]   ;;  %vm577_vm3 = vcmask 57344  }
   0xa   :  { %45 = vperm.xlu0 %742, %v35_v8   ;;  %v174_v14 = vld [vmem:[%s909_s4 + $0x18] sm:$0xff]  ;;  %v488_v15 = vld [vmem:[#allocation2] sm:$0x1]  ;;  %v168_v39 = vld [vmem:[%s908_s3 + $0x8] sm:$0xff]  ;;  %s585_s0 = sshll.u32 %s776_s9, 4  ;;  %s586_s0 = int_to_ptr.vmem [resolvable:$true] %s585_s0 }
   0xb   :  { %55 = vperm.xlu1 %743, %v37_v9   ;;  %v167_v16 = vld [vmem:[%s908_s3] sm:$0xff]  ;;  %v169_v40 = vld [vmem:[%s908_s3 + $0x10] sm:$0xff]  ;;  %v170_v41 = vld [vmem:[%s908_s3 + $0x18] sm:$0xff]  ;;  %s752_s10 = scalar_lea.vmem %s586_s0, 32  ;;  %p753_p1 = scmp.lt.s32.totalorder %s586_s0, %s586_s0 }
   0xc   :  { %652 = vmatmul.mubr.msk.f32.gmra.mrb[2].mxu0 %vm58_vm0, %v33_v10  ;;  %662 = vmatprep.mubr.msk.f32.mxu1 %vm195_vm1, %v167_v16 }
   0xd   :  { %676 = vmatprep.mubr.msk.f32.mxu0 %vm195_vm1, %v167_v16 }
   0xe   :  { %177 = vperm.xlu0 %742, %v171_v11  }
   0xf   :  { %182 = vperm.xlu1 %743, %v172_v12  }
  0x12   :  { %187 = vperm.xlu0 %742, %v173_v13  }
  0x13   :  { %192 = vperm.xlu1 %743, %v174_v14  }
  0x16   :  { %491 = vperm.xlu0 %742, %v488_v15  }
  0x85   :  { %v41_v17 = vpop.permute.xlu0 %40 }
  0x86   :  { %v51_v18 = vpop.permute.xlu1 %50 }
  0x89   :  { %v46_v19 = vpop.permute.xlu0 %45 }
  0x8a   :  { %v56_v25 = vpop.permute.xlu1 %55 }
  0x8d   :  { %v178_v43 = vpop.permute.xlu0 %177 }
  0x8e   :  { %v183_v42 = vpop.permute.xlu1 %182 }
  0x91   :  { %v188_v52 = vpop.permute.xlu0 %187 }
  0x92   :  { %v193_v49 = vpop.permute.xlu1 %192 }
  0xdb   :  { %v650_v20 = vpop.f32.mrb[0].mxu0 }
  0xdc   :  { %v146_v21 = vadd.f32 %v650_v20, %v46_v19  ;;  %v140_v22 = vpop.f32.mrb[1].mxu0  ;;  %v775_v19 = vmov 0.0  }
  0xdd   :  { %v141_v23 = vadd.f32 %v140_v22, %v41_v17 }
  0xde   :  { %v160_v24 = vmul.f32 0.01, %v146_v21 }
  0xdf   :  { %v159_v26 = vmul.f32 0.01, %v141_v23  ;;  %v653_v27 = vpop.f32.mrb[2].mxu0 }
  0xe0   :  { %v164_v28 = vmax.f32 %v146_v21, %v160_v24  ;;  %v156_v29 = vadd.f32 %v653_v27, %v56_v25  ;;  %v150_v30 = vpop.f32.mrb[3].mxu0 }
  0xe1   :  { %v163_v31 = vmax.f32 %v141_v23, %v159_v26  ;;  %v151_v32 = vadd.f32 %v150_v30, %v51_v18  ;;  %v773_v18 = vmov 0.0|0.0  }
  0xe2   :  { %v162_v33 = vmul.f32 0.01, %v156_v29 }
  0xe3   :  { %v161_v34 = vmul.f32 0.01, %v151_v32  ;;  %v707_v35 = vpack.c.bf16 %v164_v28, %v163_v31 }
  0xe4   :  { %v166_v36 = vmax.f32 %v156_v29, %v162_v33 }
  0xe5   :  { %v165_v37 = vmax.f32 %v151_v32, %v161_v34  ;;  %708 = vmatprep.subr.bf16.mxu1 %v707_v35 }
  0xe6   :  { %710 = vmatpush3.bf16.msra.mxu1 %v707_v35 }
  0xe7   :  { %v711_v38 = vpack.c.bf16 %v166_v36, %v165_v37 }
  0xe9   :  { %712 = vmatprep.subr.bf16.mxu1 %v711_v38 }
  0xea   :  { %714 = vmatpush3.bf16.msra.mxu1 %v711_v38  ;;  %v487_v38 = vld [vmem:[%s910_s5] sm:$0x1]  ;;  %s748_s5 = scalar_lea.vmem %s586_s0, 16 }
  0xeb   :  { %p749_p0 = scmp.ne.s32.totalorder %s586_s0, %s748_s5  ;;  %p754_p2 = scmp.lt.s32.totalorder %s752_s10, %s748_s5 }
  0xed   :  { %663 = vmatmul.mubr.msk.f32.vlgmr.msra.gmra.mrb[0].mxu1 %vm195_vm1, %v168_v39  ;;  %p755_p3 = por %p754_p2, %p753_p1 }
  0xee   :  { %665 = vmatprep.mubr.msk.f32.mxu1 %vm195_vm1, %v169_v40 }
  0xef   :  { %p756_p4 = pnand %p755_p3, %p749_p0 }
  0xf1   :  { %666 = vmatmul.mubr.msk.f32.gmra.mrb[2].mxu1 %vm195_vm1, %v170_v41 }
  0xf2   :  { %690 = vmatprep.mubr.msk.f32.mxu1 %vm195_vm1, %v167_v16 }
 0x1c0   :  { %v664_v44 = vpop.f32.mrb[0].mxu1 }
 0x1c1   :  { %v280_v45 = vadd.f32 %v664_v44, %v183_v42  ;;  %v274_v46 = vpop.f32.mrb[1].mxu1 }
 0x1c2   :  { %v275_v47 = vadd.f32 %v274_v46, %v178_v43 }
 0x1c3   :  { %v294_v48 = vmul.f32 0.01, %v280_v45 }
 0x1c4   :  { %v293_v50 = vmul.f32 0.01, %v275_v47  ;;  %v667_v51 = vpop.f32.mrb[2].mxu1 }
 0x1c5   :  { %v298_v53 = vmax.f32 %v280_v45, %v294_v48  ;;  %v290_v54 = vadd.f32 %v667_v51, %v193_v49  ;;  %v284_v55 = vpop.f32.mrb[3].mxu1 }
 0x1c6   :  { %v297_v56 = vmax.f32 %v275_v47, %v293_v50  ;;  %v285_v57 = vadd.f32 %v284_v55, %v188_v52 }
 0x1c7   :  { %v296_v58 = vmul.f32 0.01, %v290_v54 }
 0x1c8   :  { %v295_v59 = vmul.f32 0.01, %v285_v57  ;;  %v715_v60 = vpack.c.bf16 %v298_v53, %v297_v56 }
 0x1c9   :  { %v300_v61 = vmax.f32 %v290_v54, %v296_v58 }
 0x1ca   :  { %v299_v62 = vmax.f32 %v285_v57, %v295_v59  ;;  %716 = vmatprep.subr.bf16.mxu0 %v715_v60 }
 0x1cb   :  { %718 = vmatpush3.bf16.msra.mxu0 %v715_v60 }
 0x1cc   :  { %v719_v63 = vpack.c.bf16 %v300_v61, %v299_v62 }
 0x1ce   :  { %720 = vmatprep.subr.bf16.mxu0 %v719_v63 }
 0x1cf   :  { %722 = vmatpush3.bf16.msra.mxu0 %v719_v63 }
 0x1d0   :  { %731 = vmatprep.subr.bf16.mxu0 %v773_v18 }
 0x1d2   :  { %677 = vmatmul.mubr.msk.f32.vlgmr.msra.gmra.mrb[4].mxu0 %vm195_vm1, %v168_v39 }
 0x1d3   :  { %679 = vmatprep.mubr.msk.f32.mxu0 %vm195_vm1, %v169_v40 }
 0x1d6   :  { %680 = vmatmul.mubr.msk.f32.gmra.mrb[6].mxu0 %vm195_vm1, %v170_v41 }
 0x1d7   :  { %704 = vmatprep.mubr.msk.f32.mxu0 %vm774_vm2, %v775_v19 }
 0x2a5   :  { %v678_v0 = vpop.f32.mrb[4].mxu0 }
 0x2a6   :  { %v373_v1 = vadd.f32 %v678_v0, %v183_v42  ;;  %v367_v2 = vpop.f32.mrb[5].mxu0 }
 0x2a7   :  { %v368_v3 = vadd.f32 %v367_v2, %v178_v43 }
 0x2a8   :  { %v387_v4 = vmul.f32 0.01, %v373_v1 }
 0x2a9   :  { %v386_v5 = vmul.f32 0.01, %v368_v3  ;;  %v681_v6 = vpop.f32.mrb[6].mxu0 }
 0x2aa   :  { %v391_v7 = vmax.f32 %v373_v1, %v387_v4  ;;  %v383_v8 = vadd.f32 %v681_v6, %v193_v49  ;;  %v377_v9 = vpop.f32.mrb[7].mxu0 }
 0x2ab   :  { %v390_v10 = vmax.f32 %v368_v3, %v386_v5  ;;  %v378_v11 = vadd.f32 %v377_v9, %v188_v52 }
 0x2ac   :  { %v389_v12 = vmul.f32 0.01, %v383_v8 }
 0x2ad   :  { %v388_v13 = vmul.f32 0.01, %v378_v11  ;;  %v723_v14 = vpack.c.bf16 %v391_v7, %v390_v10 }
 0x2ae   :  { %v393_v15 = vmax.f32 %v383_v8, %v389_v12 }
 0x2af   :  { %v392_v16 = vmax.f32 %v378_v11, %v388_v13  ;;  %724 = vmatprep.subr.bf16.mxu1 %v723_v14 }
 0x2b0   :  { %726 = vmatpush3.bf16.msra.mxu1 %v723_v14 }
 0x2b1   :  { %v727_v17 = vpack.c.bf16 %v393_v15, %v392_v16 }
 0x2b3   :  { %728 = vmatprep.subr.bf16.mxu1 %v727_v17 }
 0x2b4   :  { %730 = vmatpush3.bf16.msra.mxu1 %v727_v17 }
 0x2b7   :  { %691 = vmatmul.mubr.msk.f32.vlgmr.msra.gmra.mrb[4].mxu1 %vm195_vm1, %v168_v39  ;;  %v494_v39 = vlaneseq }
 0x2b8   :  { %693 = vmatprep.mubr.msk.f32.mxu1 %vm195_vm1, %v169_v40 }
 0x2b9   :  { %v495_v40 = vshrl.u32 %v494_v39, 7 }
 0x2bb   :  { %694 = vmatmul.mubr.msk.f32.gmra.mrb[6].mxu1 %vm195_vm1, %v170_v41  ;;  %v496_v41 = vsub.s32 0, %v495_v40 }
 0x38a   :  { %v692_v20 = vpop.f32.mrb[4].mxu1 }
 0x38b   :  { %v466_v21 = vadd.f32 %v692_v20, %v183_v42  ;;  %v460_v22 = vpop.f32.mrb[5].mxu1  ;;  %v492_v42 = vpop.permute.xlu0 %491 }
 0x38c   :  { %v461_v23 = vadd.f32 %v460_v22, %v178_v43  ;;  %v497_v43 = vrot.slane %v492_v42, %v496_v41 }
 0x38d   :  { %v480_v24 = vmul.f32 0.01, %v466_v21 }
 0x38e   :  { %v479_v25 = vmul.f32 0.01, %v461_v23  ;;  %v695_v26 = vpop.f32.mrb[6].mxu1 }
 0x38f   :  { %v484_v27 = vmax.f32 %v466_v21, %v480_v24  ;;  %v476_v28 = vadd.f32 %v695_v26, %v193_v49  ;;  %v470_v29 = vpop.f32.mrb[7].mxu1 }
 0x390   :  { %v483_v30 = vmax.f32 %v461_v23, %v479_v25  ;;  %v471_v31 = vadd.f32 %v470_v29, %v188_v52 }
 0x391   :  { %v482_v32 = vmul.f32 0.01, %v476_v28 }
 0x392   :  { %v732_v33 = vpack.c.bf16 %v484_v27, %v483_v30  ;;  %v481_v34 = vmul.f32 0.01, %v471_v31 }
 0x393   :  { %v486_v35 = vmax.f32 %v476_v28, %v482_v32 }
 0x394   :  { %v485_v36 = vmax.f32 %v471_v31, %v481_v34  ;;  %733 = vmatpush3.bf16.msra.mxu0 %v732_v33 }
 0x395   :  { %734 = vmatprep.subr.bf16.mxu0 %v773_v18 }
 0x396   :  { %v735_v37 = vpack.c.bf16 %v486_v35, %v485_v36 }
 0x398   :  { %736 = vmatpush3.bf16.msra.mxu0 %v735_v37 }
 0x39b   :  { %705 = vmatmul.mubr.msk.f32.vlgmr.msra.gmra.mrb[8].mxu0 %vm195_vm1, %v487_v38 }
 0x46e   :  { %v567_v44 = vpop.f32.mrb[8].mxu0 }
 0x46f   :  { %v568_v45 = vadd.f32 %v567_v44, %v497_v43  ;;  %v706_v46 = vpop.f32.mrb[9].mxu0 }
 0x471   :  { %v611_v47 = vmul.f32 -1.442695, %v568_v45 }
 0x473   :  { %744 = vpow2.f32 %v611_v47 }
 0x47d   :  { %v745_v48 = vpop.eup %744 }
 0x47e   :  { %v574_v49 = vadd.f32 1.0, %v745_v48 }
 0x480   :  { %746 = vrcp.f32 %v574_v49 }
 0x48a   :  { %v747_v50 = vpop.eup %746 }
 0x48b   :  { %578 = vst.msk [vmem:[#allocation3] sm:$0x1] %vm577_vm3, %v747_v50 }
 0x48c   :  { %759 = shalt.err (!%p756_p4)
}
 0x48d   :  { %s760_s13 = scalar_lea.hbm %s912_s7, 16 }
 0x48e   :  { %p761_p5 = scmp.ne.s32.totalorder %s912_s7, %s760_s13  ;;  %p764_p6 = scmp.lt.u32.totalorder %s760_s13, %s912_s7 }
 0x490   :  { %p766_p7 = pnand %p764_p6, %p761_p5 }
 0x492   :  { %769 = shalt.err (!%p766_p7)
}
 0x493   :  { %588 = dma.vmem_to_hbm [thread:$0]  %s586_s0, 16, %s912_s7, [#allocation4]  }
 0x494   :  { %770 = dma.done.wait [#allocation4], 16  }
 0x495   :  { %771 = vsyncadd [#allocation4], 4294967280 }
 0x496   :  { %592 = vsyncpa [#allocation4], 1 }

</bundles_post_ra>
